<compile_context>
chip_gen: v5e
topology: v5e:2x2
jax: 0.10.0
libtpu: 0.0.40
codegen_flags: <defaults>
</compile_context>

<pallas_src>
import functools

import jax
import jax.numpy as jnp
from jax import lax
from jax.experimental import pallas as pl
from jax.experimental.pallas import tpu as pltpu

_LANE = 128
_SUBLANE = 8
_TK_CAP = 2048            # upper bound on the K tile (columns per grid step)


def _round_up(x, m):
    return (x + m - 1) // m * m


def _vmem_budget_bytes():
    """Conservative per-call VMEM budget (works on v5e/v6e/v7x)."""
    phys = 64 * 1024 * 1024
    try:
        info_fn = getattr(pltpu, "get_tpu_info", None)
        if info_fn is not None:
            phys = int(getattr(info_fn(), "vmem_capacity_bytes", phys))
    except Exception:
        phys = 64 * 1024 * 1024
    return min(phys // 2, 64 * 1024 * 1024)


def _largest_tile_units(limit_units, total_units):
    """Largest t <= limit_units that divides total_units (always >= 1)."""
    t = max(1, min(limit_units, total_units))
    while total_units % t:
        t -= 1
    return t


def _row_fixed_bytes(tm, m_pad, fused):
    if fused:
        return (tm * m_pad * 4               # f32 Gram accumulator scratch
                + 2 * tm * m_pad * 4         # resident target tile (dbl-buf)
                + 2 * _SUBLANE * m_pad * 4)  # psum output block
    return 2 * tm * m_pad * 4                # Gram output block (accumulator)


def _plan(m, k, itemsize, fused, budget_override=None):
    """Choose grid layout / tile sizes from shapes and a VMEM budget."""
    m_pad = _round_up(max(m, 1), _LANE)
    k_pad = _round_up(max(k, 1), _LANE)
    k_units = k_pad // _LANE
    budget = _vmem_budget_bytes() if budget_override is None else int(budget_override)
    gram_bytes = m_pad * m_pad * 4
    slab_unit = 2 * m_pad * _LANE * itemsize   # dbl-buffered F slab per 128 cols

    # Plan A ("konly"): whole Gram resident in VMEM, F read from HBM once.
    fixed = (3 * gram_bytes + 2 * _SUBLANE * m_pad * 4) if fused else 2 * gram_bytes
    if fixed + slab_unit <= budget:
        tk_units = _largest_tile_units(
            min((budget - fixed) // slab_unit, _TK_CAP // _LANE), k_units)
        tk = tk_units * _LANE
        return dict(kind="konly", m_pad=m_pad, tm=m_pad, k_pad=k_pad, tk=tk,
                    vmem_bytes=fixed + 2 * m_pad * tk * itemsize)

    # Plan B ("rows"): row-tiled fallback for large M.
    # TODO(synk): add a column grid axis (+ Gram symmetry) to bound VMEM for
    # very large m_pad (>~8K) on v7x.
    tm = _LANE
    for cand in (512, 256, 128):
        if m_pad % cand:
            continue
        if _row_fixed_bytes(cand, m_pad, fused) + slab_unit <= budget:
            tm = cand
            break
    fixed = _row_fixed_bytes(tm, m_pad, fused)
    avail = max(budget - fixed, slab_unit)
    tk_units = _largest_tile_units(
        max(min(avail // slab_unit, _TK_CAP // _LANE), 1), k_units)
    tk = tk_units * _LANE
    return dict(kind="rows", m_pad=m_pad, tm=tm, k_pad=k_pad, tk=tk,
                vmem_bytes=fixed + 2 * m_pad * tk * itemsize)


def _vmem_limit_bytes(plan):
    return int(min(max(32 * 1024 * 1024, plan["vmem_bytes"] + 8 * 1024 * 1024),
                   100 * 1024 * 1024))


def _padded_features(x, m_pad, k_pad, use_bf16):
    b, c, h, w = x.shape
    m, k = b * c, h * w
    feats = x.reshape(m, k)
    if use_bf16 and feats.dtype != jnp.bfloat16:
        feats = feats.astype(jnp.bfloat16)
    if (m_pad, k_pad) != (m, k):
        feats = jnp.pad(feats, ((0, m_pad - m), (0, k_pad - k)))
    return feats


# ---------------------------------------------------------------------------
# Kernels
# ---------------------------------------------------------------------------
def _gram_konly_kernel(f_ref, g_ref, *, inv_scale):
    # f_ref: [m_pad, tk] slab of F (single, de-duplicated operand).
    # g_ref: [m_pad, m_pad] resident output block used directly as accumulator.
    kk = pl.program_id(0)

    @pl.when(kk == 0)
    def _init():
        g_ref[...] = jnp.zeros_like(g_ref)

    blk = f_ref[...]
    g_ref[...] += lax.dot_general(blk, blk, (((1,), (1,)), ((), ())),
                                  preferred_element_type=jnp.float32)

    @pl.when(kk == pl.num_programs(0) - 1)
    def _finalize():
        g_ref[...] *= inv_scale


def _gram_rows_kernel(f_ref, g_ref, *, tm, inv_scale):
    # f_ref: [m_pad, tk] slab; row tile is sliced out of the resident slab.
    kk = pl.program_id(1)

    @pl.when(kk == 0)
    def _init():
        g_ref[...] = jnp.zeros_like(g_ref)

    start = pl.multiple_of(pl.program_id(0) * tm, tm)
    rows = f_ref[pl.ds(start, tm), :]
    g_ref[...] += lax.dot_general(rows, f_ref[...], (((1,), (1,)), ((), ())),
                                  preferred_element_type=jnp.float32)

    @pl.when(kk == pl.num_programs(1) - 1)
    def _finalize():
        g_ref[...] *= inv_scale


def _sq_err_rowsums(gram_acc, inv_scale, tgt):
    # Reduce the [rows, m_pad] squared error to a lane/sublane-dense
    # [8, m_pad] block: split the sublane axis into (rows//8, 8) tile groups
    # and add whole vregs together (pure VPU, no cross-lane work).
    d = gram_acc * inv_scale - tgt
    sq = d * d
    r, c = sq.shape
    return jnp.sum(sq.reshape(r // _SUBLANE, _SUBLANE, c), axis=0)


def _loss_konly_kernel(f_ref, t_ref, psum_ref, acc_ref, *, inv_scale):
    kk = pl.program_id(0)

    @pl.when(kk == 0)
    def _init():
        acc_ref[...] = jnp.zeros_like(acc_ref)

    blk = f_ref[...]
    acc_ref[...] += lax.dot_general(blk, blk, (((1,), (1,)), ((), ())),
                                    preferred_element_type=jnp.float32)

    @pl.when(kk == pl.num_programs(0) - 1)
    def _finalize():
        psum_ref[...] = _sq_err_rowsums(acc_ref[...], inv_scale, t_ref[...])


def _loss_rows_kernel(f_ref, t_ref, psum_ref, acc_ref, *, tm, inv_scale):
    kk = pl.program_id(1)

    @pl.when(kk == 0)
    def _init():
        acc_ref[...] = jnp.zeros_like(acc_ref)

    start = pl.multiple_of(pl.program_id(0) * tm, tm)
    rows = f_ref[pl.ds(start, tm), :]
    acc_ref[...] += lax.dot_general(rows, f_ref[...], (((1,), (1,)), ((), ())),
                                    preferred_element_type=jnp.float32)

    @pl.when(kk == pl.num_programs(1) - 1)
    def _finalize():
        psum_ref[...] = _sq_err_rowsums(acc_ref[...], inv_scale, t_ref[...])


# ---------------------------------------------------------------------------
# Wrappers
# ---------------------------------------------------------------------------
def _gram_padded(x, use_bf16=False, budget_override=None):
    """Zero-padded Gram matrix [m_pad, m_pad] (f32).  Returns (gram, M)."""
    b, c, h, w = x.shape
    m, k = b * c, h * w
    feat_dtype = jnp.bfloat16 if use_bf16 else x.dtype
    itemsize = jnp.dtype(feat_dtype).itemsize
    plan = _plan(m, k, itemsize, fused=False, budget_override=budget_override)
    m_pad, tm, k_pad, tk = plan["m_pad"], plan["tm"], plan["k_pad"], plan["tk"]
    feats = _padded_features(x, m_pad, k_pad, use_bf16)
    inv_scale = 1.0 / float(m * k)
    k_tiles = k_pad // tk
    m_tiles = m_pad // tm
    cost = pl.CostEstimate(
        flops=2 * m_pad * m_pad * k_pad,
        transcendentals=0,
        bytes_accessed=m_pad * k_pad * itemsize * m_tiles + m_pad * m_pad * 4)
    params = pltpu.CompilerParams(
        dimension_semantics=(("arbitrary",) if plan["kind"] == "konly"
                             else ("parallel", "arbitrary")),
        vmem_limit_bytes=_vmem_limit_bytes(plan))

    if plan["kind"] == "konly":
        gram = pl.pallas_call(
            functools.partial(_gram_konly_kernel, inv_scale=inv_scale),
            out_shape=jax.ShapeDtypeStruct((m_pad, m_pad), jnp.float32),
            grid_spec=pltpu.PrefetchScalarGridSpec(
                num_scalar_prefetch=0,
                grid=(k_tiles,),
                in_specs=[pl.BlockSpec((m_pad, tk), lambda kk: (0, kk))],
                out_specs=pl.BlockSpec((m_pad, m_pad), lambda kk: (0, 0)),
            ),
            compiler_params=params,
            cost_estimate=cost,
        )(feats)
    else:
        gram = pl.pallas_call(
            functools.partial(_gram_rows_kernel, tm=tm, inv_scale=inv_scale),
            out_shape=jax.ShapeDtypeStruct((m_pad, m_pad), jnp.float32),
            grid_spec=pltpu.PrefetchScalarGridSpec(
                num_scalar_prefetch=0,
                grid=(m_tiles, k_tiles),
                in_specs=[pl.BlockSpec((m_pad, tk), lambda i, kk: (0, kk))],
                out_specs=pl.BlockSpec((tm, m_pad), lambda i, kk: (i, 0)),
            ),
            compiler_params=params,
            cost_estimate=cost,
        )(feats)
    return gram, m


@functools.partial(jax.jit, static_argnames=("use_bf16", "budget_override"))
def compute_gram_matrix(x, use_bf16=False, budget_override=None):
    """Pallas equivalent of the PyTorch compute_gram_matrix (NCHW input)."""
    gram, m = _gram_padded(x, use_bf16=use_bf16, budget_override=budget_override)
    return gram[:m, :m]


@functools.partial(jax.jit, static_argnames=("use_bf16", "budget_override"))
def style_loss(x, target_gram, use_bf16=False, budget_override=None):
    """mean((gram(x) - target_gram)**2); Gram + MSE fused in one Pallas kernel.

    `target_gram` may be the unpadded [M, M] Gram or an already zero-padded
    [m_pad, m_pad] Gram (as cached by CustomStyleLoss).
    """
    b, c, h, w = x.shape
    m, k = b * c, h * w
    feat_dtype = jnp.bfloat16 if use_bf16 else x.dtype
    itemsize = jnp.dtype(feat_dtype).itemsize
    plan = _plan(m, k, itemsize, fused=True, budget_override=budget_override)
    m_pad, tm, k_pad, tk = plan["m_pad"], plan["tm"], plan["k_pad"], plan["tk"]
    feats = _padded_features(x, m_pad, k_pad, use_bf16)
    inv_scale = 1.0 / float(m * k)
    tgt = target_gram.astype(jnp.float32)
    if tgt.shape != (m_pad, m_pad):
        tgt = jnp.pad(tgt, ((0, m_pad - tgt.shape[0]), (0, m_pad - tgt.shape[1])))
    k_tiles = k_pad // tk
    m_tiles = m_pad // tm
    cost = pl.CostEstimate(
        flops=2 * m_pad * m_pad * k_pad + 3 * m_pad * m_pad,
        transcendentals=0,
        bytes_accessed=(m_pad * k_pad * itemsize * m_tiles
                        + m_pad * m_pad * 4
                        + m_tiles * _SUBLANE * m_pad * 4))
    params = pltpu.CompilerParams(
        dimension_semantics=(("arbitrary",) if plan["kind"] == "konly"
                             else ("parallel", "arbitrary")),
        vmem_limit_bytes=_vmem_limit_bytes(plan))

    if plan["kind"] == "konly":
        partials = pl.pallas_call(
            functools.partial(_loss_konly_kernel, inv_scale=inv_scale),
            out_shape=jax.ShapeDtypeStruct((_SUBLANE, m_pad), jnp.float32),
            grid_spec=pltpu.PrefetchScalarGridSpec(
                num_scalar_prefetch=0,
                grid=(k_tiles,),
                in_specs=[pl.BlockSpec((m_pad, tk), lambda kk: (0, kk)),
                          pl.BlockSpec((m_pad, m_pad), lambda kk: (0, 0))],
                out_specs=pl.BlockSpec((_SUBLANE, m_pad), lambda kk: (0, 0)),
                scratch_shapes=[pltpu.VMEM((m_pad, m_pad), jnp.float32)],
            ),
            compiler_params=params,
            cost_estimate=cost,
        )(feats, tgt)
    else:
        partials = pl.pallas_call(
            functools.partial(_loss_rows_kernel, tm=tm, inv_scale=inv_scale),
            out_shape=jax.ShapeDtypeStruct((m_tiles * _SUBLANE, m_pad),
                                           jnp.float32),
            grid_spec=pltpu.PrefetchScalarGridSpec(
                num_scalar_prefetch=0,
                grid=(m_tiles, k_tiles),
                in_specs=[pl.BlockSpec((m_pad, tk), lambda i, kk: (0, kk)),
                          pl.BlockSpec((tm, m_pad), lambda i, kk: (i, 0))],
                out_specs=pl.BlockSpec((_SUBLANE, m_pad), lambda i, kk: (i, 0)),
                scratch_shapes=[pltpu.VMEM((tm, m_pad), jnp.float32)],
            ),
            compiler_params=params,
            cost_estimate=cost,
        )(feats, tgt)

    # Tiny epilogue: combine lane/sublane partial sums, apply the MSE mean.
    return jnp.sum(partials) * (1.0 / float(m * m))


class CustomStyleLoss:
    """JAX/Pallas port of the PyTorch CustomStyleLoss module (forward only)."""

    def __init__(self, target_feature, use_bf16=False):
        self._use_bf16 = bool(use_bf16)
        gram_padded, m = _gram_padded(target_feature, use_bf16=self._use_bf16)
        # Detached target Gram; keep the zero-padded version cached so the
        # fused loss kernel can stream it without re-padding.
        self._target_padded = lax.stop_gradient(gram_padded)
        self.target = self._target_padded[:m, :m]
        self.loss = None

    def __call__(self, x):
        # forward(): compute self.loss = MSE(gram(x), target), return x as-is.
        self.loss = style_loss(x, self._target_padded, use_bf16=self._use_bf16)
        return x


# ---------------------------------------------------------------------------
# Demo / smoke test
# ---------------------------------------------------------------------------
if __name__ == "__main__":
    key = jax.random.PRNGKey(0)
    k_tgt, k_in, k_tgt2, k_in2 = jax.random.split(key, 4)

    def _ref_gram(v):
        b, c, h, w = v.shape
        f = v.reshape(b * c, h * w).astype(jnp.float32)
        return (f @ f.T) / (b * c * h * w)

    # --- Main module-level check (small NCHW shape, K-only kernel path) ---
    B, C, H, W = 2, 4, 16, 16
    target_feature = jax.random.normal(k_tgt, (B, C, H, W), dtype=jnp.float32)
    x = jax.random.normal(k_in, (B, C, H, W), dtype=jnp.float32)

    module = CustomStyleLoss(target_feature)
    out = jax.block_until_ready(module(x))
    loss = jax.block_until_ready(module.loss)
    gram_x = jax.block_until_ready(compute_gram_matrix(x))

    ref_gx = _ref_gram(x)
    ref_loss = jnp.mean((ref_gx - _ref_gram(target_feature)) ** 2)

    assert out.shape == x.shape and jnp.allclose(out, x)
    assert gram_x.shape == ref_gx.shape
    assert jnp.allclose(gram_x, ref_gx, rtol=2e-2, atol=1e-4)
    assert jnp.allclose(loss, ref_loss, rtol=5e-2, atol=1e-7)

    # --- Exercise the row-tiled fallback (multiple row tiles + multiple K
    #     tiles) by forcing a tiny VMEM budget at a still-small shape. ---
    B2, C2, H2, W2 = 2, 72, 16, 16        # M = 144 -> m_pad = 256 -> 2 row tiles
    tgt_feat2 = jax.random.normal(k_tgt2, (B2, C2, H2, W2), dtype=jnp.float32)
    x2 = jax.random.normal(k_in2, (B2, C2, H2, W2), dtype=jnp.float32)
    tiny_budget = 512 * 1024
    gram2 = jax.block_until_ready(
        compute_gram_matrix(x2, budget_override=tiny_budget))
    loss2 = jax.block_until_ready(
        style_loss(x2, _ref_gram(tgt_feat2), budget_override=tiny_budget))
    ref_g2 = _ref_gram(x2)
    ref_l2 = jnp.mean((ref_g2 - _ref_gram(tgt_feat2)) ** 2)
    assert jnp.allclose(gram2, ref_g2, rtol=2e-2, atol=1e-5)
    assert jnp.allclose(loss2, ref_l2, rtol=5e-2, atol=1e-9)

    print("KERNEL_OK")
</pallas_src>

<mosaic_0001>
module attributes {stable_mosaic.version = 11 : i64} {
  func.func @_gram_konly_kernel(%arg0: i32, %arg1: memref<128x256xf32, #tpu.memory_space<vmem>>, %arg2: memref<128x128xf32, #tpu.memory_space<vmem>>) attributes {dimension_semantics = [#tpu.dimension_semantics<arbitrary>], iteration_bounds = array<i64: 1>, scalar_prefetch = 0 : i64, scratch_operands = 0 : i64, tpu.core_type = #tpu.core_type<tc>, window_params = [{transform_indices = @transform_0, window_bounds = array<i64: 128, 256>}, {pipeline_mode = #tpu.pipeline_mode<synchronous>, transform_indices = @transform_1, window_bounds = array<i64: 128, 128>}]} {
    %c0_i32 = arith.constant 0 : i32
    %0 = arith.cmpi eq, %arg0, %c0_i32 : i32
    %1 = arith.extui %0 : i1 to i32
    %c0_i32_0 = arith.constant 0 : i32
    %2 = arith.cmpi ne, %1, %c0_i32_0 : i32
    scf.if %2 {
      %cst_8 = arith.constant 0.000000e+00 : f32
      %11 = vector.broadcast %cst_8 : f32 to vector<128x128xf32>
      %c0_9 = arith.constant 0 : index
      %c0_10 = arith.constant 0 : index
      %12 = vector.load %arg2[%c0_9, %c0_10] : memref<128x128xf32, #tpu.memory_space<vmem>>, vector<128x128xf32>
      tpu.vector_store %arg2[%c0_9, %c0_10], %11 {strides = array<i32>} : memref<128x128xf32, #tpu.memory_space<vmem>>, vector<128x128xf32>,
    } else {
    }
    %c0 = arith.constant 0 : index
    %c0_1 = arith.constant 0 : index
    %3 = vector.load %arg1[%c0, %c0_1] : memref<128x256xf32, #tpu.memory_space<vmem>>, vector<128x256xf32>
    %c0_2 = arith.constant 0 : index
    %c0_3 = arith.constant 0 : index
    %4 = vector.load %arg2[%c0_2, %c0_3] : memref<128x128xf32, #tpu.memory_space<vmem>>, vector<128x128xf32>
    %cst = arith.constant dense<0.000000e+00> : vector<128x128xf32>
    %5 = tpu.matmul %3, %3, %cst {dimension_numbers = #tpu.dot_dimension_numbers<[1], [1], [0], [0], [0, 0, 1, 0], [], []>} : vector<128x256xf32>, vector<128x256xf32>, vector<128x128xf32> -> vector<128x128xf32>
    %6 = arith.addf %4, %5 : vector<128x128xf32>
    %c0_4 = arith.constant 0 : index
    %c0_5 = arith.constant 0 : index
    %7 = vector.load %arg2[%c0_4, %c0_5] : memref<128x128xf32, #tpu.memory_space<vmem>>, vector<128x128xf32>
    tpu.vector_store %arg2[%c0_4, %c0_5], %6 {strides = array<i32>} : memref<128x128xf32, #tpu.memory_space<vmem>>, vector<128x128xf32>,
    %c0_i32_6 = arith.constant 0 : i32
    %8 = arith.cmpi eq, %arg0, %c0_i32_6 : i32
    %9 = arith.extui %8 : i1 to i32
    %c0_i32_7 = arith.constant 0 : i32
    %10 = arith.cmpi ne, %9, %c0_i32_7 : i32
    scf.if %10 {
      %c0_8 = arith.constant 0 : index
      %c0_9 = arith.constant 0 : index
      %11 = vector.load %arg2[%c0_8, %c0_9] : memref<128x128xf32, #tpu.memory_space<vmem>>, vector<128x128xf32>
      %cst_10 = arith.constant 4.8828125E-4 : f32
      %12 = vector.broadcast %cst_10 : f32 to vector<128x128xf32>
      %13 = arith.mulf %11, %12 : vector<128x128xf32>
      %c0_11 = arith.constant 0 : index
      %c0_12 = arith.constant 0 : index
      %14 = vector.load %arg2[%c0_11, %c0_12] : memref<128x128xf32, #tpu.memory_space<vmem>>, vector<128x128xf32>
      tpu.vector_store %arg2[%c0_11, %c0_12], %13 {strides = array<i32>} : memref<128x128xf32, #tpu.memory_space<vmem>>, vector<128x128xf32>,
    } else {
    }
    return
  }
  func.func @transform_0(%arg0: i32) -> (i32, i32) {
    %c0_i32 = arith.constant 0 : i32
    %c0_i32_0 = arith.constant 0 : i32
    return %c0_i32, %arg0 : i32, i32
  }
  func.func @transform_1(%arg0: i32) -> (i32, i32) {
    %c0_i32 = arith.constant 0 : i32
    %c0_i32_0 = arith.constant 0 : i32
    %c0_i32_1 = arith.constant 0 : i32
    return %c0_i32, %c0_i32_0 : i32, i32
  }
}

</mosaic_0001>

<bundles_post_ra>
// kernel: tpu_custom_call.1
= control target key start
LH: loop header
LB: loop body
LE: loop exit
PB: predicated region body
PF: predicated region fallthrough
CT: control target
= control target key end

     0   :  { %6 = vsyncpa [#allocation3], 0  ;;  %s528_s0 = inlined_call_operand.hbm [shape: f32[128,256], index: 0, kind: input, shape index: {}]   ;;  %s529_s1 = inlined_call_operand.hbm [shape: f32[128,128], index: 1, kind: output, shape index: {}]  }
   0x1   :  { %7 = vsyncpa [#allocation4], 0  ;;  %s12_s8 = sshll.u32 %s528_s0, 4  ;;  %s416_s9 = smov [#allocation2]   ;;  %s13_s8 = int_to_ptr.hbm [resolvable:$true] %s12_s8 }
   0x2   :  { %s14_s10 = sshll.u32 %s416_s9, 4  ;;  %s417_s11 = smov 256   ;;  %s15_s10 = int_to_ptr.vmem [resolvable:$true] %s14_s10 }
   0x3   :  { %s418_s12 = smov 16  }
   0x4   :  { %20 = dma.hbm_to_vmem [thread:$0]  %s13_s8, 4096, %s15_s10, [#allocation3], %s417_s11, %s417_s11, %s418_s12  }
   0x5   :  { %412 = dma.done.wait [#allocation3], 4096  }
   0x6   :  { %413 = vsyncadd [#allocation3], 4294963200  ;;  %v435_v0 = vld [vmem:[#allocation2 + $0xf0] sm:$0xff]  ;;  %v437_v1 = vld [vmem:[#allocation2 + $0xf8] sm:$0xff]  ;;  %s419_s0 = smov [#allocation5]   ;;  %s312_s16 = sshll.u32 %s529_s1, 4  ;;  %s313_s16 = int_to_ptr.hbm [resolvable:$true] %s312_s16 }
   0x7   :  { %325 = vmatpush.xpose.msra.mxu2 %v435_v0  ;;  %341 = vmatpush.xpose.msra.mxu3 %v437_v1  ;;  %v441_v2 = vld [vmem:[#allocation2 + $0xe0] sm:$0xff]  ;;  %v443_v3 = vld [vmem:[#allocation2 + $0xe8] sm:$0xff]  ;;  %v449_v4 = vld [vmem:[#allocation2 + $0xd0] sm:$0xff]  ;;  %s310_s13 = sshll.u32 %s419_s0, 4  ;;  %s420_s17 = smov 128   ;;  %s311_s13 = int_to_ptr.vmem [resolvable:$true] %s310_s13 }
   0x8   :  { %93 = vmatpush.xpose.msra.mxu0 %v435_v0  ;;  %158 = vmatpush.xpose.msra.mxu1 %v437_v1  ;;  %v451_v5 = vld [vmem:[#allocation2 + $0xd8] sm:$0xff]  ;;  %v457_v6 = vld [vmem:[#allocation2 + $0xc0] sm:$0xff]  ;;  %v459_v7 = vld [vmem:[#allocation2 + $0xc8] sm:$0xff]  ;;  %s421_s18 = smov 8  }
   0x9   :  { %v465_v8 = vld [vmem:[#allocation2 + $0xb0] sm:$0xff]  ;;  %v467_v9 = vld [vmem:[#allocation2 + $0xb8] sm:$0xff]  ;;  %v473_v10 = vld [vmem:[#allocation2 + $0xa0] sm:$0xff] }
   0xa   :  { %v475_v11 = vld [vmem:[#allocation2 + $0xa8] sm:$0xff]  ;;  %v481_v12 = vld [vmem:[#allocation2 + $0x90] sm:$0xff]  ;;  %v483_v13 = vld [vmem:[#allocation2 + $0x98] sm:$0xff] }
   0xb   :  { %326 = vmatpush.xpose.msra.mxu2 %v441_v2  ;;  %342 = vmatpush.xpose.msra.mxu3 %v443_v3  ;;  %v61_v14 = vld [vmem:[#allocation2 + $0x80] sm:$0xff]  ;;  %v62_v15 = vld [vmem:[#allocation2 + $0x88] sm:$0xff]  ;;  %v491_v16 = vld [vmem:[#allocation2 + $0x70] sm:$0xff] }
   0xc   :  { %94 = vmatpush.xpose.msra.mxu0 %v441_v2  ;;  %159 = vmatpush.xpose.msra.mxu1 %v443_v3  ;;  %v493_v17 = vld [vmem:[#allocation2 + $0x78] sm:$0xff]  ;;  %v497_v18 = vld [vmem:[#allocation2 + $0x60] sm:$0xff]  ;;  %v499_v19 = vld [vmem:[#allocation2 + $0x68] sm:$0xff] }
   0xd   :  { %v55_v20 = vld [vmem:[#allocation2 + $0x50] sm:$0xff]  ;;  %v56_v21 = vld [vmem:[#allocation2 + $0x58] sm:$0xff]  ;;  %v53_v22 = vld [vmem:[#allocation2 + $0x40] sm:$0xff] }
   0xe   :  { %v54_v23 = vld [vmem:[#allocation2 + $0x48] sm:$0xff]  ;;  %v51_v24 = vld [vmem:[#allocation2 + $0x30] sm:$0xff]  ;;  %v52_v25 = vld [vmem:[#allocation2 + $0x38] sm:$0xff] }
   0xf   :  { %327 = vmatpush.xpose.msra.mxu2 %v449_v4  ;;  %343 = vmatpush.xpose.msra.mxu3 %v451_v5  ;;  %v49_v26 = vld [vmem:[#allocation2 + $0x20] sm:$0xff]  ;;  %v50_v27 = vld [vmem:[#allocation2 + $0x28] sm:$0xff]  ;;  %v47_v28 = vld [vmem:[#allocation2 + $0x10] sm:$0xff] }
  0x10   :  { %95 = vmatpush.xpose.msra.mxu0 %v449_v4  ;;  %160 = vmatpush.xpose.msra.mxu1 %v451_v5  ;;  %v48_v29 = vld [vmem:[#allocation2 + $0x18] sm:$0xff]  ;;  %v45_v30 = vld [vmem:[#allocation2] sm:$0xff]  ;;  %v46_v31 = vld [vmem:[#allocation2 + $0x8] sm:$0xff] }
  0x13   :  { %328 = vmatpush.xpose.msra.mxu2 %v457_v6  ;;  %344 = vmatpush.xpose.msra.mxu3 %v459_v7 }
  0x14   :  { %96 = vmatpush.xpose.msra.mxu0 %v457_v6  ;;  %161 = vmatpush.xpose.msra.mxu1 %v459_v7 }
  0x17   :  { %329 = vmatpush.xpose.msra.mxu2 %v465_v8  ;;  %345 = vmatpush.xpose.msra.mxu3 %v467_v9 }
  0x18   :  { %97 = vmatpush.xpose.msra.mxu0 %v465_v8  ;;  %162 = vmatpush.xpose.msra.mxu1 %v467_v9 }
  0x1b   :  { %330 = vmatpush.xpose.msra.mxu2 %v473_v10  ;;  %346 = vmatpush.xpose.msra.mxu3 %v475_v11 }
  0x1c   :  { %98 = vmatpush.xpose.msra.mxu0 %v473_v10  ;;  %163 = vmatpush.xpose.msra.mxu1 %v475_v11 }
  0x1f   :  { %331 = vmatpush.xpose.msra.mxu2 %v481_v12  ;;  %347 = vmatpush.xpose.msra.mxu3 %v483_v13 }
  0x20   :  { %99 = vmatpush.xpose.msra.mxu0 %v481_v12  ;;  %164 = vmatpush.xpose.msra.mxu1 %v483_v13 }
  0x23   :  { %332 = vmatpush.xpose.msra.mxu2 %v61_v14  ;;  %348 = vmatpush.xpose.msra.mxu3 %v62_v15 }
  0x24   :  { %100 = vmatpush.xpose.msra.mxu0 %v61_v14  ;;  %165 = vmatpush.xpose.msra.mxu1 %v62_v15 }
  0x27   :  { %333 = vmatpush.xpose.msra.mxu2 %v491_v16  ;;  %349 = vmatpush.xpose.msra.mxu3 %v493_v17 }
  0x28   :  { %101 = vmatpush.xpose.msra.mxu0 %v491_v16  ;;  %166 = vmatpush.xpose.msra.mxu1 %v493_v17 }
  0x2b   :  { %334 = vmatpush.xpose.msra.mxu2 %v497_v18  ;;  %350 = vmatpush.xpose.msra.mxu3 %v499_v19 }
  0x2c   :  { %102 = vmatpush.xpose.msra.mxu0 %v497_v18  ;;  %167 = vmatpush.xpose.msra.mxu1 %v499_v19 }
  0x2f   :  { %335 = vmatpush.xpose.msra.mxu2 %v55_v20  ;;  %351 = vmatpush.xpose.msra.mxu3 %v56_v21 }
  0x30   :  { %103 = vmatpush.xpose.msra.mxu0 %v55_v20  ;;  %168 = vmatpush.xpose.msra.mxu1 %v56_v21 }
  0x33   :  { %336 = vmatpush.xpose.msra.mxu2 %v53_v22  ;;  %352 = vmatpush.xpose.msra.mxu3 %v54_v23 }
  0x34   :  { %104 = vmatpush.xpose.msra.mxu0 %v53_v22  ;;  %169 = vmatpush.xpose.msra.mxu1 %v54_v23 }
  0x37   :  { %337 = vmatpush.xpose.msra.mxu2 %v51_v24  ;;  %353 = vmatpush.xpose.msra.mxu3 %v52_v25 }
  0x38   :  { %105 = vmatpush.xpose.msra.mxu0 %v51_v24  ;;  %170 = vmatpush.xpose.msra.mxu1 %v52_v25 }
  0x3b   :  { %338 = vmatpush.xpose.msra.mxu2 %v49_v26  ;;  %354 = vmatpush.xpose.msra.mxu3 %v50_v27 }
  0x3c   :  { %106 = vmatpush.xpose.msra.mxu0 %v49_v26  ;;  %171 = vmatpush.xpose.msra.mxu1 %v50_v27 }
  0x3f   :  { %339 = vmatpush.xpose.msra.mxu2 %v47_v28  ;;  %355 = vmatpush.xpose.msra.mxu3 %v48_v29 }
  0x40   :  { %107 = vmatpush.xpose.msra.mxu0 %v47_v28  ;;  %172 = vmatpush.xpose.msra.mxu1 %v48_v29 }
  0x43   :  { %340 = vmatpush.xpose.msra.mxu2 %v45_v30  ;;  %356 = vmatpush.xpose.msra.mxu3 %v46_v31 }
  0x44   :  { %108 = vmatpush.xpose.msra.mxu0 %v45_v30  ;;  %173 = vmatpush.xpose.msra.mxu1 %v46_v31 }
  0x46   :  { %133 = vmatmul.f32.vlgmr.msra.gmra.mxu2 %v61_v14  ;;  %198 = vmatmul.f32.vlgmr.msra.gmra.mxu3 %v62_v15 }
  0x47   :  { %109 = vmatmul.f32.vlgmr.msra.gmra.mxu0 %v45_v30  ;;  %174 = vmatmul.f32.vlgmr.msra.gmra.mxu1 %v46_v31 }
  0x4e   :  { %136 = vmatmul.f32.gmra.mxu2 %v481_v12  ;;  %201 = vmatmul.f32.gmra.mxu3 %v483_v13 }
  0x4f   :  { %112 = vmatmul.f32.gmra.mxu0 %v47_v28  ;;  %177 = vmatmul.f32.gmra.mxu1 %v48_v29 }
  0x56   :  { %139 = vmatmul.f32.gmra.mxu2 %v473_v10  ;;  %204 = vmatmul.f32.gmra.mxu3 %v475_v11 }
  0x57   :  { %115 = vmatmul.f32.gmra.mxu0 %v49_v26  ;;  %180 = vmatmul.f32.gmra.mxu1 %v50_v27 }
  0x5e   :  { %142 = vmatmul.f32.gmra.mxu2 %v465_v8  ;;  %207 = vmatmul.f32.gmra.mxu3 %v467_v9 }
  0x5f   :  { %118 = vmatmul.f32.gmra.mxu0 %v51_v24  ;;  %183 = vmatmul.f32.gmra.mxu1 %v52_v25 }
  0x66   :  { %145 = vmatmul.f32.gmra.mxu2 %v457_v6  ;;  %210 = vmatmul.f32.gmra.mxu3 %v459_v7 }
  0x67   :  { %121 = vmatmul.f32.gmra.mxu0 %v53_v22  ;;  %186 = vmatmul.f32.gmra.mxu1 %v54_v23 }
  0x6e   :  { %148 = vmatmul.f32.gmra.mxu2 %v449_v4  ;;  %213 = vmatmul.f32.gmra.mxu3 %v451_v5 }
  0x6f   :  { %124 = vmatmul.f32.gmra.mxu0 %v55_v20  ;;  %189 = vmatmul.f32.gmra.mxu1 %v56_v21 }
  0x76   :  { %151 = vmatmul.f32.gmra.mxu2 %v441_v2  ;;  %216 = vmatmul.f32.gmra.mxu3 %v443_v3 }
  0x77   :  { %127 = vmatmul.f32.gmra.mxu0 %v497_v18  ;;  %192 = vmatmul.f32.gmra.mxu1 %v499_v19 }
  0x7e   :  { %154 = vmatmul.f32.gmra.mxu2 %v435_v0  ;;  %219 = vmatmul.f32.gmra.mxu3 %v437_v1 }
  0x7f   :  { %130 = vmatmul.f32.gmra.mxu0 %v491_v16  ;;  %195 = vmatmul.f32.gmra.mxu1 %v493_v17 }
  0xc4   :  { %v110_v32 = vpop.f32.mrf.mxu0  ;;  %v175_v33 = vpop.f32.mrf.mxu1 }
  0xc5   :  { %v176_v34 = vadd.f32 %v175_v33, %v110_v32 }
  0xc7   :  { %v274_v36 = vmul.f32 0.00048828125, %v176_v34 }
  0xc9   :  { %v134_v35 = vpop.f32.mrf.mxu2  ;;  %v199_v37 = vpop.f32.mrf.mxu3  ;;  %290 = vst [vmem:[#allocation5] sm:$0xff] %v274_v36 }
  0xca   :  { %v200_v38 = vadd.f32 %v199_v37, %v134_v35 }
  0xcc   :  { %v113_v39 = vpop.f32.mrf.mxu0  ;;  %v178_v40 = vpop.f32.mrf.mxu1  ;;  %v282_v42 = vmul.f32 0.00048828125, %v200_v38 }
  0xcd   :  { %v179_v41 = vadd.f32 %v178_v40, %v113_v39 }
  0xce   :  { %298 = vst [vmem:[#allocation5 + $0x40] sm:$0xff] %v282_v42 }
  0xcf   :  { %v275_v44 = vmul.f32 0.00048828125, %v179_v41 }
  0xd1   :  { %v137_v43 = vpop.f32.mrf.mxu2  ;;  %v202_v45 = vpop.f32.mrf.mxu3  ;;  %291 = vst [vmem:[#allocation5 + $0x8] sm:$0xff] %v275_v44 }
  0xd2   :  { %v203_v46 = vadd.f32 %v202_v45, %v137_v43 }
  0xd4   :  { %v116_v47 = vpop.f32.mrf.mxu0  ;;  %v181_v48 = vpop.f32.mrf.mxu1  ;;  %v283_v50 = vmul.f32 0.00048828125, %v203_v46 }
  0xd5   :  { %v182_v49 = vadd.f32 %v181_v48, %v116_v47 }
  0xd6   :  { %299 = vst [vmem:[#allocation5 + $0x48] sm:$0xff] %v283_v50 }
  0xd7   :  { %v276_v52 = vmul.f32 0.00048828125, %v182_v49 }
  0xd9   :  { %v140_v51 = vpop.f32.mrf.mxu2  ;;  %v205_v53 = vpop.f32.mrf.mxu3  ;;  %292 = vst [vmem:[#allocation5 + $0x10] sm:$0xff] %v276_v52 }
  0xda   :  { %v206_v54 = vadd.f32 %v205_v53, %v140_v51 }
  0xdc   :  { %v119_v55 = vpop.f32.mrf.mxu0  ;;  %v184_v56 = vpop.f32.mrf.mxu1  ;;  %v284_v58 = vmul.f32 0.00048828125, %v206_v54 }
  0xdd   :  { %v185_v57 = vadd.f32 %v184_v56, %v119_v55 }
  0xde   :  { %300 = vst [vmem:[#allocation5 + $0x50] sm:$0xff] %v284_v58 }
  0xdf   :  { %v277_v60 = vmul.f32 0.00048828125, %v185_v57 }
  0xe1   :  { %v143_v59 = vpop.f32.mrf.mxu2  ;;  %v208_v61 = vpop.f32.mrf.mxu3  ;;  %293 = vst [vmem:[#allocation5 + $0x18] sm:$0xff] %v277_v60 }
  0xe2   :  { %v209_v62 = vadd.f32 %v208_v61, %v143_v59 }
  0xe4   :  { %v122_v63 = vpop.f32.mrf.mxu0  ;;  %v187_v0 = vpop.f32.mrf.mxu1  ;;  %v285_v2 = vmul.f32 0.00048828125, %v209_v62 }
  0xe5   :  { %v188_v1 = vadd.f32 %v187_v0, %v122_v63 }
  0xe6   :  { %301 = vst [vmem:[#allocation5 + $0x58] sm:$0xff] %v285_v2 }
  0xe7   :  { %v278_v4 = vmul.f32 0.00048828125, %v188_v1 }
  0xe9   :  { %v146_v3 = vpop.f32.mrf.mxu2  ;;  %v211_v5 = vpop.f32.mrf.mxu3  ;;  %294 = vst [vmem:[#allocation5 + $0x20] sm:$0xff] %v278_v4 }
  0xea   :  { %v212_v6 = vadd.f32 %v211_v5, %v146_v3 }
  0xec   :  { %v125_v7 = vpop.f32.mrf.mxu0  ;;  %v190_v8 = vpop.f32.mrf.mxu1  ;;  %v286_v10 = vmul.f32 0.00048828125, %v212_v6 }
  0xed   :  { %v191_v9 = vadd.f32 %v190_v8, %v125_v7 }
  0xee   :  { %302 = vst [vmem:[#allocation5 + $0x60] sm:$0xff] %v286_v10 }
  0xef   :  { %v279_v12 = vmul.f32 0.00048828125, %v191_v9 }
  0xf1   :  { %v149_v11 = vpop.f32.mrf.mxu2  ;;  %v214_v13 = vpop.f32.mrf.mxu3  ;;  %295 = vst [vmem:[#allocation5 + $0x28] sm:$0xff] %v279_v12 }
  0xf2   :  { %v215_v14 = vadd.f32 %v214_v13, %v149_v11 }
  0xf4   :  { %v128_v15 = vpop.f32.mrf.mxu0  ;;  %v193_v16 = vpop.f32.mrf.mxu1  ;;  %v287_v18 = vmul.f32 0.00048828125, %v215_v14 }
  0xf5   :  { %v194_v17 = vadd.f32 %v193_v16, %v128_v15 }
  0xf6   :  { %303 = vst [vmem:[#allocation5 + $0x68] sm:$0xff] %v287_v18 }
  0xf7   :  { %v280_v20 = vmul.f32 0.00048828125, %v194_v17 }
  0xf9   :  { %v152_v19 = vpop.f32.mrf.mxu2  ;;  %v217_v21 = vpop.f32.mrf.mxu3  ;;  %296 = vst [vmem:[#allocation5 + $0x30] sm:$0xff] %v280_v20 }
  0xfa   :  { %v218_v22 = vadd.f32 %v217_v21, %v152_v19 }
  0xfc   :  { %v131_v23 = vpop.f32.mrf.mxu0  ;;  %v196_v24 = vpop.f32.mrf.mxu1  ;;  %v288_v26 = vmul.f32 0.00048828125, %v218_v22 }
  0xfd   :  { %v197_v25 = vadd.f32 %v196_v24, %v131_v23 }
  0xfe   :  { %304 = vst [vmem:[#allocation5 + $0x70] sm:$0xff] %v288_v26 }
  0xff   :  { %v281_v28 = vmul.f32 0.00048828125, %v197_v25 }
 0x101   :  { %v155_v27 = vpop.f32.mrf.mxu2  ;;  %v220_v29 = vpop.f32.mrf.mxu3  ;;  %297 = vst [vmem:[#allocation5 + $0x38] sm:$0xff] %v281_v28 }
 0x102   :  { %v221_v30 = vadd.f32 %v220_v29, %v155_v27 }
 0x104   :  { %v289_v31 = vmul.f32 0.00048828125, %v221_v30 }
 0x106   :  { %305 = vst [vmem:[#allocation5 + $0x78] sm:$0xff] %v289_v31 }
 0x107   :  { %318 = dma.vmem_to_hbm [thread:$0]  %s311_s13, 2048, %s313_s16, [#allocation4], %s420_s17, %s420_s17, %s421_s18  }
 0x108   :  { %414 = dma.done.wait [#allocation4], 2048  }
 0x109   :  { %415 = vsyncadd [#allocation4], 4294965248 }
 0x10a   :  { %323 = vsyncpa [#allocation3], 1 }
 0x10b   :  { %324 = vsyncpa [#allocation4], 1 }

</bundles_post_ra>
